<compile_context>
chip_gen: v7x
topology: tpu7x:2x2x1
jax: 0.10.0
libtpu: 0.0.40
codegen_flags: <defaults>
</compile_context>

<pallas_src>
import math

import jax
import jax.numpy as jnp
from jax import lax
from jax.experimental import pallas as pl
from jax.experimental.pallas import tpu as pltpu


def gcn_resnet_kernel(x_ref, w_ref, o_ref):
    # x_ref: (1, B, N, F)   one problem's input
    # w_ref: (F, Fp)        GraphConvolution weight, zero-padded to Fp lanes
    # o_ref: (1, B, Fp)     lane-dense output slab (columns F..Fp-1 are zero)
    x = x_ref[0]                                   # (B, N, F)

    # adj is rank-1 (0.25*ones) and the AvgPool row-select re-picks the same
    # (identical) row, so GC + permute + pool + squeeze collapse to:
    xbar = 0.25 * jnp.sum(x, axis=1)               # (B, F)   VPU reduction
    pooled = jnp.dot(xbar, w_ref[...],
                     preferred_element_type=jnp.float32)       # (B, Fp)

    # ScaleDotProductAttention with q = k = v = pooled (attention over batch).
    # Zero-padded lanes contribute nothing to the contraction.
    score = lax.dot_general(pooled, pooled, (((1,), (1,)), ((), ())),
                            preferred_element_type=jnp.float32)  # (B, B)
    score = score - jnp.max(score, axis=-1, keepdims=True)
    e = jnp.exp(score)
    p = e * pl.reciprocal(jnp.sum(e, axis=-1, keepdims=True), approx=True)
    v = jnp.dot(p, pooled, preferred_element_type=jnp.float32)   # (B, Fp)

    o_ref[0] = v.astype(o_ref.dtype)


def get_adj():
    # get_A(): A = I(3);  get_a(A): D @ (offdiag_ones + A) @ D, D = 0.5*I
    A = jnp.eye(3, dtype=jnp.float32)
    a = jnp.array([[0., 1., 1.], [1., 0., 1.], [1., 1., 0.]], jnp.float32) + A
    d = 0.5 * jnp.eye(3, dtype=jnp.float32)
    return d @ a @ d  # == 0.25 * ones(3,3)


def make_gc_weight(key, in_features=10, out_features=10):
    # GraphConvolution.reset_parameters: uniform(-stdv, stdv), stdv = 1/sqrt(out)
    stdv = 1.0 / math.sqrt(out_features)
    return jax.random.uniform(key, (in_features, out_features),
                              dtype=jnp.float32, minval=-stdv, maxval=stdv)


def gcn_resnet_forward(x, w, *, lane_pad=128):
    """x: (G, B, N, F) batch of independent problems, or a single (B, N, F)."""
    squeeze_g = (x.ndim == 3)
    if squeeze_g:
        x = x[None]
    G, B, N, F = x.shape
    Fp = max(lane_pad, F)

    # Zero-pad the weight's output dim so the kernel writes a lane-dense slab.
    w_pad = jnp.zeros((F, Fp), jnp.float32).at[:, :F].set(w.astype(jnp.float32))

    out = pl.pallas_call(
        gcn_resnet_kernel,
        out_shape=jax.ShapeDtypeStruct((G, B, Fp), jnp.float32),
        grid=(G,),
        in_specs=[
            pl.BlockSpec((1, B, N, F), lambda g: (g, 0, 0, 0)),
            pl.BlockSpec((F, Fp), lambda g: (0, 0)),
        ],
        out_specs=pl.BlockSpec((1, B, Fp), lambda g: (g, 0, 0)),
        compiler_params=pltpu.CompilerParams(
            dimension_semantics=("parallel",)),   # shards G across TCs on v7x
    )(x, w_pad)

    out = out[..., :F]
    if squeeze_g:
        out = out[0]
    return out


def reference_forward(x, w):
    # Pure-JAX replica of the PyTorch forward (no algebraic collapse).
    adj = get_adj()
    support = jnp.einsum('...nf,fg->...ng', x, w)
    gc_out = jnp.einsum('ij,...jf->...if', adj, support)        # (..., 3, F)
    perm = jnp.swapaxes(gc_out, -1, -2)                         # (..., F, 3)
    pooled = 0.5 * (perm[..., 0] + perm[..., 1])                # (..., F)
    score = jax.nn.softmax(
        jnp.einsum('...bf,...cf->...bc', pooled, pooled), axis=-1)
    return jnp.einsum('...bc,...cf->...bf', score, pooled)


if __name__ == "__main__":
    key = jax.random.PRNGKey(0)
    kx, kw = jax.random.split(key)
    G, B, N, F = 8, 4, 3, 10
    x = jax.random.normal(kx, (G, B, N, F), dtype=jnp.float32)
    w = make_gc_weight(kw, in_features=F, out_features=F)

    # Batched path: G independent GCNResnet forwards in one pallas_call.
    out = jax.block_until_ready(gcn_resnet_forward(x, w))
    ref = reference_forward(x, w)
    assert out.shape == (G, B, F)
    assert jnp.allclose(out, ref, atol=1e-3, rtol=1e-3), (out, ref)

    # Single-problem path, matching the original module's (B, N, F) input.
    out1 = jax.block_until_ready(gcn_resnet_forward(x[0], w))
    assert out1.shape == (B, F)
    assert jnp.allclose(out1, ref[0], atol=1e-3, rtol=1e-3), (out1, ref[0])

    print("KERNEL_OK")
</pallas_src>

<mosaic_0001>
module attributes {stable_mosaic.version = 11 : i64} {
  func.func @gcn_resnet_kernel(%arg0: i32, %arg1: memref<1x4x3x10xf32, #tpu.memory_space<vmem>>, %arg2: memref<10x128xf32, #tpu.memory_space<vmem>>, %arg3: memref<1x4x128xf32, #tpu.memory_space<vmem>>) attributes {dimension_semantics = [#tpu.dimension_semantics<parallel>], iteration_bounds = array<i64: 8>, scalar_prefetch = 0 : i64, scratch_operands = 0 : i64, tpu.core_type = #tpu.core_type<tc>, window_params = [{transform_indices = @transform_0, window_bounds = array<i64: 1, 4, 3, 10>}, {pipeline_mode = #tpu.pipeline_mode<synchronous>, transform_indices = @transform_1, window_bounds = array<i64: 10, 128>}, {transform_indices = @transform_2, window_bounds = array<i64: 1, 4, 128>}]} {
    %c0 = arith.constant 0 : index
    %c0_0 = arith.constant 0 : index
    %c0_1 = arith.constant 0 : index
    %c0_2 = arith.constant 0 : index
    %0 = vector.load %arg1[%c0, %c0_0, %c0_1, %c0_2] : memref<1x4x3x10xf32, #tpu.memory_space<vmem>>, vector<1x4x3x10xf32>
    %1 = vector.shape_cast %0 : vector<1x4x3x10xf32> to vector<4x3x10xf32>
    %cst = arith.constant dense<0.000000e+00> : vector<4x10xf32>
    %2 = vector.multi_reduction <add>, %1, %cst [1] : vector<4x3x10xf32> to vector<4x10xf32>
    %cst_3 = arith.constant 2.500000e-01 : f32
    %3 = vector.broadcast %cst_3 : f32 to vector<4x10xf32>
    %4 = arith.mulf %3, %2 : vector<4x10xf32>
    %c0_4 = arith.constant 0 : index
    %c0_5 = arith.constant 0 : index
    %5 = vector.load %arg2[%c0_4, %c0_5] : memref<10x128xf32, #tpu.memory_space<vmem>>, vector<10x128xf32>
    %cst_6 = arith.constant dense<0.000000e+00> : vector<4x128xf32>
    %6 = tpu.matmul %4, %5, %cst_6 {dimension_numbers = #tpu.dot_dimension_numbers<[1], [0], [0], [1], [0, 0, 1, 1], [], []>} : vector<4x10xf32>, vector<10x128xf32>, vector<4x128xf32> -> vector<4x128xf32>
    %cst_7 = arith.constant dense<0.000000e+00> : vector<4x4xf32>
    %7 = tpu.matmul %6, %6, %cst_7 {dimension_numbers = #tpu.dot_dimension_numbers<[1], [1], [0], [0], [0, 0, 1, 0], [], []>} : vector<4x128xf32>, vector<4x128xf32>, vector<4x4xf32> -> vector<4x4xf32>
    %cst_8 = arith.constant dense<0xFF800000> : vector<4xf32>
    %8 = vector.multi_reduction <maximumf>, %7, %cst_8 [1] : vector<4x4xf32> to vector<4xf32>
    %9 = vector.shape_cast %8 : vector<4xf32> to vector<4x1xf32>
    %10 = vector.broadcast %9 : vector<4x1xf32> to vector<4x4xf32>
    %11 = arith.subf %7, %10 : vector<4x4xf32>
    %12 = math.exp %11 : vector<4x4xf32>
    %cst_9 = arith.constant dense<0.000000e+00> : vector<4xf32>
    %13 = vector.multi_reduction <add>, %12, %cst_9 [1] : vector<4x4xf32> to vector<4xf32>
    %14 = vector.shape_cast %13 : vector<4xf32> to vector<4x1xf32>
    %15 = tpu.reciprocal %14 {approx = true} : vector<4x1xf32> -> vector<4x1xf32>
    %16 = vector.broadcast %15 : vector<4x1xf32> to vector<4x4xf32>
    %17 = arith.mulf %12, %16 : vector<4x4xf32>
    %cst_10 = arith.constant dense<0.000000e+00> : vector<4x128xf32>
    %18 = tpu.matmul %17, %6, %cst_10 {dimension_numbers = #tpu.dot_dimension_numbers<[1], [0], [0], [1], [0, 0, 1, 1], [], []>} : vector<4x4xf32>, vector<4x128xf32>, vector<4x128xf32> -> vector<4x128xf32>
    %c0_11 = arith.constant 0 : index
    %c0_12 = arith.constant 0 : index
    %c0_13 = arith.constant 0 : index
    %19 = vector.load %arg3[%c0_11, %c0_12, %c0_13] : memref<1x4x128xf32, #tpu.memory_space<vmem>>, vector<1x4x128xf32>
    %20 = vector.shape_cast %19 : vector<1x4x128xf32> to vector<4x128xf32>
    %21 = vector.shape_cast %18 : vector<4x128xf32> to vector<1x4x128xf32>
    tpu.vector_store %arg3[%c0_11, %c0_12, %c0_13], %21 {strides = array<i32>} : memref<1x4x128xf32, #tpu.memory_space<vmem>>, vector<1x4x128xf32>,
    return
  }
  func.func @transform_0(%arg0: i32) -> (i32, i32, i32, i32) {
    %c0_i32 = arith.constant 0 : i32
    %c0_i32_0 = arith.constant 0 : i32
    %c0_i32_1 = arith.constant 0 : i32
    %c0_i32_2 = arith.constant 0 : i32
    return %arg0, %c0_i32, %c0_i32_0, %c0_i32_1 : i32, i32, i32, i32
  }
  func.func @transform_1(%arg0: i32) -> (i32, i32) {
    %c0_i32 = arith.constant 0 : i32
    %c0_i32_0 = arith.constant 0 : i32
    %c0_i32_1 = arith.constant 0 : i32
    return %c0_i32, %c0_i32_0 : i32, i32
  }
  func.func @transform_2(%arg0: i32) -> (i32, i32, i32) {
    %c0_i32 = arith.constant 0 : i32
    %c0_i32_0 = arith.constant 0 : i32
    %c0_i32_1 = arith.constant 0 : i32
    return %arg0, %c0_i32, %c0_i32_0 : i32, i32, i32
  }
}

</mosaic_0001>

<bundles_post_ra>
// kernel: tpu_custom_call.1
= control target key start
LH: loop header
LB: loop body
LE: loop exit
PB: predicated region body
PF: predicated region fallthrough
CT: control target
= control target key end

     0   :  { %7 = vsyncpa [#allocation3], 0  ;;  %s786_s0 = inlined_call_operand.vmem [shape: f32[8,4,3,10], index: 0, kind: input, shape index: {}]   ;;  %s787_s1 = inlined_call_operand.vmem [shape: f32[10,128], index: 1, kind: input, shape index: {}]   ;;  %s788_s2 = inlined_call_operand.hbm [shape: f32[8,4,128], index: 2, kind: output, shape index: {}]  }
   0x1   :  { %9 = vsyncpa [#allocation3 + $0x1], 0  ;;  %s677_s9 = smov 0   ;;  %s679_s10 = smov 0  }
   0x2   :  { %s681_s11 = smov 0   ;;  %s683_s12 = smov 0  }
   0x3 LB: > { %s698_s13 = sadd.s32 4294967295, %s655_s12   ;;  %s502_s14 = sadd.s32 4294967294, %s655_s12   ;;  %s655_s12 = sphi %s683_s12, %s794_s12   ;;  %s651_s11 = sphi %s681_s11, %s793_s11   ;;  %s647_s10 = sphi %s679_s10, %s792_s10   ;;  %s643_s9 = sphi %s677_s9, %s791_s9  }
   0x4   : > { %s702_s15 = sadd.s32 1, %s655_s12   ;;  %s69_s16 = sadd.s32 1, %s651_s11 }
   0x5   : > { %s66_s17 = ssub.s32 %s655_s12, %s702_s15  ;;  %p79_p0 = scmp.ne.s32.totalorder %s651_s11, %s647_s10 }
   0x6   : > { %p67_p1 = scmp.eq.s32.totalorder %s66_s17, 0  ;;  %p80_p2 = scmp.eq.s32.totalorder %s698_s13, 7 }
   0x7   : > { %p85_p3 = scmp.ne.s32.totalorder %s647_s10, %s643_s9  ;;  %p86_p4 = scmp.eq.s32.totalorder %s502_s14, 7 }
   0x8   : > { %s713_s18 = scalar_select %p67_p1, %s651_s11, %s69_s16  }
   0x9   : > { %p715_p5 = por %p80_p2, %p79_p0  ;;  %p719_p6 = por %p86_p4, %p85_p3 }
   0xa   : > { %p505_p7 = scmp.ge.s32.totalorder %s655_s12, 1  ;;  %p115_p8 = scmp.lt.s32.totalorder %s655_s12, 9 }
   0xc   : > { %p116_p9 = pnand %p505_p7, %p115_p8 }
   0xd   : > { %v179_v0 = vld [vmem:[%s787_s1] sm:$0xff] (!%p116_p9)  ;;  %v180_v1 = vld [vmem:[%s787_s1 + $0x8] sm:$0x3] (!%p116_p9)  ;;  %vm194_vm0 = vcmask (!%p116_p9), 1041408   ;;  %v657_v2 = vmov (!%p116_p9), 0.0|0.0   ;;  %vm658_vm1 = vmmov (!%p116_p9), 1  }
   0xe   : > { %119 = sbr.rel (%p116_p9) target bundleno = 1011 (0x3f3), region = 28  ;;  %542 = vmatprep.subr.bf16.mxu0 (!%p116_p9), %v657_v2  ;;  %v543_v3 = vpack.c.bf16 (!%p116_p9), %v180_v1, %v179_v0  ;;  %vm544_vm2 = vmpackc.low (!%p116_p9), %vm194_vm0, %vm658_vm1  ;;  %p137_p10 = scmp.lt.s32.totalorder (!%p116_p9), %s698_s13, 7  ;;  %vm659_vm3 = vmmov (!%p116_p9), 0   ;;  %v660_v4 = vmov (!%p116_p9), 0.0   ;;  %vm146_vm4 = vcmask (!%p116_p9), 75776  }
   0xf   : > { %529 = vmatprep.mubr.msk.f32.mxu0 (!%p116_p9), %vm659_vm3, %v660_v4  ;;  %532 = vmatprep.subr.mxu1 (!%p116_p9), %v660_v4  ;;  %vm185_vm5 = vcmask (!%p116_p9), 1041409   ;;  %vm187_vm6 = vcmask (!%p116_p9), 1042434   ;;  %vm189_vm7 = vcmask (!%p116_p9), 1043459   ;;  %vm191_vm8 = vcmask (!%p116_p9), 80896   ;;  %s134_s30 = sand.u32 (!%p116_p9), 1, %s647_s10   ;;  %s514_s6 = sshll.u32 (!%p116_p9), %s698_s13, 6 }
  0x10   : > { %545 = vmatpush3.bf16.msk.msra.mxu0 (!%p116_p9), %vm544_vm2, %v543_v3  ;;  %534 = vmatprep.mubr.msk.f32.mxu1 (!%p116_p9), %vm659_vm3, %v660_v4  ;;  %vm354_vm9 = vcmask (!%p116_p9), 1043456   ;;  %vm338_vm10 = vcmask (!%p116_p9), 27648   ;;  %vm350_vm11 = vcmask (!%p116_p9), 31744   ;;  %s506_s3 = sshll.u32 (!%p116_p9), %s134_s30, 2  ;;  %s746_s14 = scalar_lea.hbm (!%p116_p9), %s788_s2, %s514_s6 }
  0x11   : > { %537 = vmatprep.subr.mxu0 (!%p116_p9), %v660_v4  ;;  %s136_s4 = scalar_lea.vmem (!%p116_p9), [#allocation2], %s506_s3  ;;  %s430_s16 = scalar_lea.sflag (!%p116_p9), [#allocation3], %s134_s30 }
  0x12   : > { %s443_s5 = sshll.u32 (!%p116_p9), %s136_s4, 4  ;;  %s741_s5 = int_to_ptr.vmem [resolvable:$true] %s443_s5 }
  0x13   : > { %s593_s17 = scalar_lea.vmem (!%p116_p9), %s741_s5, 64 }
  0x14   : > { %p594_p11 = scmp.ne.s32.totalorder (!%p116_p9), %s741_s5, %s593_s17 }
  0x15   : > { %s138_s25 = scalar_select %p137_p10, %s698_s13, 7 }
  0x16   : > { %p595_p12 = pnand %p594_p11, %p715_p5  ;;  %s661_s13 = smov [#allocation2]  }
  0x17   : > { %s517_s26 = sshll.u32 %s138_s25, 4  ;;  %s597_s21 = sshll.u32 %s661_s13, 4  ;;  %s598_s21 = int_to_ptr.vmem [resolvable:$false] %s597_s21 }
  0x18   : > { %s141_s29 = scalar_lea.vmem %s786_s0, %s517_s26  ;;  %p596_p13 = pneg %p595_p12 }
  0x19   : > { %v142_v5 = vld [vmem:[%s141_s29] sm:$0x7]  ;;  %v143_v6 = vld [vmem:[%s141_s29 + $0x4] sm:$0x7]  ;;  %v144_v7 = vld [vmem:[%s141_s29 + $0x8] sm:$0x7]  ;;  %p600_p0 = scmp.lt.s32.totalorder %s741_s5, %s598_s21 }
  0x1a   : > { %v145_v8 = vld [vmem:[%s141_s29 + $0xc] sm:$0x7]  ;;  %v147_v9 = vsel %vm146_vm4, %v142_v5, 0.0  ;;  %v154_v10 = vsel %vm146_vm4, %v143_v6, 0.0  ;;  %v161_v11 = vsel %vm146_vm4, %v144_v7, 0.0  ;;  %s599_s22 = scalar_lea.vmem %s598_s21, 128 }
  0x1b   : > { %v148_v12 = vrot.slane %v147_v9, 4  ;;  %v155_v13 = vrot.slane %v154_v10, 4  ;;  %v162_v14 = vrot.slane %v161_v11, 4  ;;  %v168_v15 = vsel %vm146_vm4, %v145_v8, 0.0  ;;  %p601_p1 = scmp.lt.s32.totalorder %s599_s22, %s593_s17 }
  0x1c   : > { %v169_v16 = vrot.slane %v168_v15, 4 }
  0x1d   : > { %v149_v17 = vadd.f32 %v148_v12, %v147_v9  ;;  %v156_v18 = vadd.f32 %v155_v13, %v154_v10  ;;  %v163_v19 = vadd.f32 %v162_v14, %v161_v11  ;;  %p602_p2 = por %p601_p1, %p600_p0 }
  0x1e   : > { %v170_v20 = vadd.f32 %v169_v16, %v168_v15 }
  0x1f   : > { %v150_v21 = vrot.slane %v149_v17, 2  ;;  %v157_v22 = vrot.slane %v156_v18, 2  ;;  %v164_v23 = vrot.slane %v163_v19, 2  ;;  %p603_p3 = pnand %p602_p2, %p596_p13 }
  0x20   : > { %v171_v24 = vrot.slane %v170_v20, 2 }
  0x21   : > { %v151_v25 = vadd.f32 %v150_v21, %v149_v17  ;;  %v158_v26 = vadd.f32 %v157_v22, %v156_v18  ;;  %v165_v27 = vadd.f32 %v164_v23, %v163_v19 }
  0x22   : > { %v172_v28 = vadd.f32 %v171_v24, %v170_v20 }
  0x23   : > { %v152_v29 = vrot.slane %v151_v25, 1  ;;  %v159_v30 = vrot.slane %v158_v26, 1  ;;  %v166_v31 = vrot.slane %v165_v27, 1 }
  0x24   : > { %v173_v32 = vrot.slane %v172_v28, 1 }
  0x25   : > { %v153_v33 = vadd.f32 %v152_v29, %v151_v25  ;;  %v160_v34 = vadd.f32 %v159_v30, %v158_v26  ;;  %v167_v35 = vadd.f32 %v166_v31, %v165_v27 }
  0x26   : > { %v174_v36 = vadd.f32 %v173_v32, %v172_v28 }
  0x27   : > { %v175_v37 = vmul.f32 0.25, %v153_v33  ;;  %v176_v38 = vmul.f32 0.25, %v160_v34  ;;  %v177_v39 = vmul.f32 0.25, %v167_v35 }
  0x28   : > { %v178_v40 = vmul.f32 0.25, %v174_v36 }
  0x29   : > { %v186_v41 = vsel %vm185_vm5, %v176_v38, %v175_v37 }
  0x2a   : > { %v188_v42 = vsel %vm187_vm6, %v177_v39, %v186_v41 }
  0x2b   : > { %v190_v43 = vsel %vm189_vm7, %v178_v40, %v188_v42 }
  0x2c   : > { %530 = vmatmul.mubr.msk.f32.vlgmr.msra.gmra.mrb[0].mxu0 %vm191_vm8, %v190_v43 }
  0x2d   : > { %539 = vmatprep.mubr.msk.f32.mxu0 %vm659_vm3, %v660_v4 }
  0xff   : > { %v264_v44 = vpop.f32.mrb[0].mxu0 }
 0x100   : > { %v531_v45 = vpop.f32.mrb[1].mxu0  ;;  %533 = vmatpush3.xpose.msra.mxu1 %v264_v44  ;;  %538 = vmatpush3.msk.msra.mxu0 %vm354_vm9, %v264_v44 }
 0x103   : > { %535 = vmatmul.mubr.f32.vlgmr.msra.gmra.mrb[0].mxu1 %v264_v44 }
 0x1d6   : > { %v334_v46 = vpop.f32.mrb[0].mxu1 }
 0x1d7   : > { %v536_v47 = vpop.f32.mrb[1].mxu1  ;;  %v339_v48 = vsel %vm338_vm10, %v334_v46, -inf }
 0x1d8   : > { %340 = vmax.xlane.f32.xlu0 %v339_v48 }
 0x265   : > { %v341_v49 = vpop.xlane.xlu0 %340 }
 0x266   : > { %v342_v50 = vsub.f32 %v334_v46, %v341_v49 }
 0x268   : > { %v343_v51 = vmul.f32 1.442695, %v342_v50 }
 0x26a   : > { %589 = vpow2.f32 %v343_v51 }
 0x274   : > { %v590_v52 = vpop.eup %589 }
 0x275   : > { %v345_v53 = vsel %vm338_vm10, %v590_v52, 0.0 }
 0x276   : > { %346 = vadd.xlane.f32.xlu0 %v345_v53 }
 0x303   : > { %v347_v54 = vpop.xlane.xlu0 %346 }
 0x304   : > { %591 = vrcp.f32 %v347_v54 }
 0x30e   : > { %v592_v55 = vpop.eup %591 }
 0x30f   : > { %v349_v56 = vmul.f32 %v592_v55, %v590_v52 }
 0x311   : > { %540 = vmatmul.mubr.msk.f32.vlgmr.msra.gmra.mrb[2].mxu0 %vm350_vm11, %v349_v56 }
 0x3e4   : > { %v424_v57 = vpop.f32.mrb[2].mxu0 }
 0x3e5   : > { %428 = vst [vmem:[%s136_s4] sm:$0xf] %v424_v57  ;;  %v541_v58 = vpop.f32.mrb[3].mxu0 }
 0x3e6   : > { %606 = shalt.err (!%p603_p3)
}
 0x3e7   : > { %s607_s23 = scalar_lea.hbm %s746_s14, 64  ;;  %s611_s26 = scalar_lea.hbm %s788_s2, 512 }
 0x3e8   : > { %p608_p4 = scmp.ne.s32.totalorder %s746_s14, %s607_s23  ;;  %p612_p9 = scmp.lt.u32.totalorder %s746_s14, %s788_s2 }
 0x3e9   : > { %p613_p10 = scmp.lt.u32.totalorder %s611_s26, %s607_s23  ;;  %p615_p12 = scmp.lt.u32.totalorder %s607_s23, %s746_s14 }
 0x3ea   : > { %p609_p7 = pnand %p608_p4, %p715_p5 }
 0x3eb   : > { %p614_p11 = por %p613_p10, %p612_p9 }
 0x3ec   : > { %p610_p8 = pneg %p609_p7 }
 0x3ed   : > { %p616_p13 = por %p615_p12, %p614_p11 }
 0x3ef   : > { %p617_p0 = pnand %p616_p13, %p610_p8 }
 0x3f1   : > { %620 = shalt.err (!%p617_p0)
}
 0x3f2   : > { %546 = dma.vmem_to_hbm [thread:$0]  (%p715_p5), %s741_s5, 64, %s746_s14, %s430_s16  }
 0x3f3 PF: > { %p552_p1 = scmp.ge.s32.totalorder %s655_s12, 2  ;;  %s455_s29 = sand.u32 1, %s643_s9  }
 0x3f4   : > { %s456_s30 = scalar_lea.sflag [#allocation3], %s455_s29 }
 0x3f5   : > { %p549_p2 = pnand %p552_p1, %p719_p6 }
 0x3f7   : > { %638 = dma.done.wait (!%p549_p2), %s456_s30, 64  }
 0x3f8   : > { %640 = vsyncadd (!%p549_p2), %s456_s30, 4294967232  ;;  %p12_p3 = scmp.ge.s32.totalorder %s702_s15, 10   ;;  %s791_s9 = smov %s647_s10 }
 0x3f9   : > { %s792_s10 = smov %s651_s11  ;;  %s793_s11 = smov %s713_s18 }
 0x3fa   : > { %s794_s12 = smov %s702_s15  ;;  %14 = sbr.rel (!%p12_p3) target bundleno = 3 (0x3), region = 63 }
 0x401   :  { %461 = vsyncpa [#allocation3], 1 }
 0x402   :  { %463 = vsyncpa [#allocation3 + $0x1], 1 }

</bundles_post_ra>
